<compile_context>
chip_gen: v7x
topology: tpu7x:2x2x1
jax: 0.10.0
libtpu: 0.0.40
codegen_flags: <defaults>
</compile_context>

<pallas_src>
import jax
import jax.numpy as jnp
from jax.experimental import pallas as pl
from jax.experimental.pallas import tpu as pltpu

_LANES = 128
_SUBLANES = 8


def _logreg_kernel(params_ref, x_ref, o_ref):
    # params_ref: SMEM (3,) f32 = [w0, w1, b]  (scalar path, no VMEM tile/DMA)
    # x_ref:      VMEM (2, block_rows, 128) feature-major lane-dense slab
    # o_ref:      VMEM (block_rows, 128) lane-dense output slab
    w0 = params_ref[0]
    w1 = params_ref[1]
    b = params_ref[2]

    # Pure VPU fused multiply-add; no degenerate 2x1 MXU matmul.
    z = x_ref[0] * w0 + x_ref[1] * w1 + b

    # sigmoid(z) = 0.5*(tanh(z/2)+1): one EUP transcendental, no divide,
    # stable for both signs of z.
    o_ref[...] = 0.5 * (jnp.tanh(0.5 * z) + 1.0)


def logistic_regression_forward(x, weight, bias, *, block_rows=None):
    """x: (B, 2) float; weight: (1, 2) (PyTorch nn.Linear layout); bias: (1,)."""
    B = x.shape[0]
    x = x.astype(jnp.float32)

    # --- lane-dense, feature-major re-layout of the batch -------------------
    rows_needed = max(1, pl.cdiv(B, _LANES))

    if block_rows is None:
        # Aim for ~8 grid steps on large batches (pipeline overlap + v7x
        # megacore sharding across 2 TCs), with per-step slabs between
        # 512 rows (256 KiB) and 2048 rows (1 MiB).  Never split tiny inputs:
        # v5e/v6e have a single TensorCore, so extra steps are pure overhead.
        block_rows = pl.cdiv(rows_needed, 8)
        block_rows = min(max(block_rows, 512), 2048)
    # Never exceed the data; always honor the (8, 128) tiling constraint.
    block_rows = min(block_rows, rows_needed)
    block_rows = max(_SUBLANES, ((block_rows + _SUBLANES - 1) // _SUBLANES) * _SUBLANES)

    n_blocks = pl.cdiv(rows_needed, block_rows)
    rows_pad = n_blocks * block_rows
    b_pad = rows_pad * _LANES

    # Single fused transpose+pad copy: (B, 2) -> (2, rows_pad, 128).
    # The padded tail is zeros (evaluates to sigmoid(b), discarded on return).
    x_slab = jnp.pad(x.T, ((0, 0), (0, b_pad - B))).reshape(2, rows_pad, _LANES)

    # Scalars [w0, w1, b] go through SMEM (no padded VMEM tiles, no per-step DMAs).
    params = jnp.concatenate(
        [weight.reshape(-1).astype(jnp.float32),
         bias.reshape(-1).astype(jnp.float32)]
    )  # shape (3,)

    out_slab = pl.pallas_call(
        _logreg_kernel,
        out_shape=jax.ShapeDtypeStruct((rows_pad, _LANES), jnp.float32),
        grid=(n_blocks,),
        in_specs=[
            pl.BlockSpec(memory_space=pltpu.SMEM),                        # [w0, w1, b]
            pl.BlockSpec((2, block_rows, _LANES), lambda i: (0, i, 0)),   # x slab
        ],
        out_specs=pl.BlockSpec((block_rows, _LANES), lambda i: (i, 0)),   # lane-dense out
        compiler_params=pltpu.CompilerParams(
            dimension_semantics=("parallel",),   # megacore-shard batch axis (v7x)
        ),
    )(params, x_slab)

    # Undo the re-layout: lane-aligned batches are a pure reshape (no copy);
    # otherwise slice off the padded tail.
    out = out_slab.reshape(-1)
    if b_pad != B:
        out = out[:B]
    return out.reshape(B, 1)


if __name__ == "__main__":
    key = jax.random.PRNGKey(0)
    kx, kw, kb, kx2 = jax.random.split(key, 4)

    # Deterministic synthetic parameters matching nn.Linear(2, 1) shapes.
    bound = 1.0 / jnp.sqrt(2.0)  # PyTorch default init bound: 1/sqrt(in_features)
    weight = jax.random.uniform(kw, (1, 2), jnp.float32, -bound, bound)
    bias = jax.random.uniform(kb, (1,), jnp.float32, -bound, bound)

    # Small deterministic input batch (non-lane-aligned path).
    x = jax.random.normal(kx, (8, 2), jnp.float32)
    y = jax.block_until_ready(logistic_regression_forward(x, weight, bias))
    y_ref = jax.nn.sigmoid(x @ weight.T + bias)
    assert y.shape == (8, 1)
    assert jnp.allclose(y, y_ref, atol=2e-6), "mismatch vs reference (B=8)"

    # Lane-aligned batch (exercises the copy-free epilogue path).
    x2 = jax.random.normal(kx2, (1024, 2), jnp.float32)
    y2 = jax.block_until_ready(logistic_regression_forward(x2, weight, bias))
    y2_ref = jax.nn.sigmoid(x2 @ weight.T + bias)
    assert y2.shape == (1024, 1)
    assert jnp.allclose(y2, y2_ref, atol=2e-6), "mismatch vs reference (B=1024)"

    print("KERNEL_OK")
</pallas_src>

<mosaic_0001>
module attributes {stable_mosaic.version = 11 : i64} {
  func.func @_logreg_kernel(%arg0: i32, %arg1: memref<3xf32, #tpu.memory_space<smem>>, %arg2: memref<2x8x128xf32, #tpu.memory_space<vmem>>, %arg3: memref<8x128xf32, #tpu.memory_space<vmem>>) attributes {dimension_semantics = [#tpu.dimension_semantics<parallel>], iteration_bounds = array<i64: 1>, scalar_prefetch = 0 : i64, scratch_operands = 0 : i64, tpu.core_type = #tpu.core_type<tc>, window_params = [{transform_indices = @transform_0, window_bounds = array<i64: 3>}, {transform_indices = @transform_1, window_bounds = array<i64: 2, 8, 128>}, {transform_indices = @transform_2, window_bounds = array<i64: 8, 128>}]} {
    %c0 = arith.constant 0 : index
    %0 = memref.load %arg1[%c0] : memref<3xf32, #tpu.memory_space<smem>>
    %c1 = arith.constant 1 : index
    %1 = memref.load %arg1[%c1] : memref<3xf32, #tpu.memory_space<smem>>
    %c2 = arith.constant 2 : index
    %2 = memref.load %arg1[%c2] : memref<3xf32, #tpu.memory_space<smem>>
    %c0_0 = arith.constant 0 : index
    %c0_1 = arith.constant 0 : index
    %c0_2 = arith.constant 0 : index
    %3 = vector.load %arg2[%c0_0, %c0_1, %c0_2] : memref<2x8x128xf32, #tpu.memory_space<vmem>>, vector<1x8x128xf32>
    %4 = vector.shape_cast %3 : vector<1x8x128xf32> to vector<8x128xf32>
    %5 = vector.broadcast %0 : f32 to vector<8x128xf32>
    %6 = arith.mulf %4, %5 : vector<8x128xf32>
    %c1_3 = arith.constant 1 : index
    %c0_4 = arith.constant 0 : index
    %c0_5 = arith.constant 0 : index
    %7 = vector.load %arg2[%c1_3, %c0_4, %c0_5] : memref<2x8x128xf32, #tpu.memory_space<vmem>>, vector<1x8x128xf32>
    %8 = vector.shape_cast %7 : vector<1x8x128xf32> to vector<8x128xf32>
    %9 = vector.broadcast %1 : f32 to vector<8x128xf32>
    %10 = arith.mulf %8, %9 : vector<8x128xf32>
    %11 = arith.addf %6, %10 : vector<8x128xf32>
    %12 = vector.broadcast %2 : f32 to vector<8x128xf32>
    %13 = arith.addf %11, %12 : vector<8x128xf32>
    %cst = arith.constant 5.000000e-01 : f32
    %14 = vector.broadcast %cst : f32 to vector<8x128xf32>
    %15 = arith.mulf %14, %13 : vector<8x128xf32>
    %16 = math.tanh %15 : vector<8x128xf32>
    %cst_6 = arith.constant 1.000000e+00 : f32
    %17 = vector.broadcast %cst_6 : f32 to vector<8x128xf32>
    %18 = arith.addf %16, %17 : vector<8x128xf32>
    %cst_7 = arith.constant 5.000000e-01 : f32
    %19 = vector.broadcast %cst_7 : f32 to vector<8x128xf32>
    %20 = arith.mulf %19, %18 : vector<8x128xf32>
    %c0_8 = arith.constant 0 : index
    %c0_9 = arith.constant 0 : index
    %21 = vector.load %arg3[%c0_8, %c0_9] : memref<8x128xf32, #tpu.memory_space<vmem>>, vector<8x128xf32>
    tpu.vector_store %arg3[%c0_8, %c0_9], %20 {strides = array<i32>} : memref<8x128xf32, #tpu.memory_space<vmem>>, vector<8x128xf32>,
    return
  }
  func.func @transform_0(%arg0: i32) -> i32 {
    %c0_i32 = arith.constant 0 : i32
    %c0_i32_0 = arith.constant 0 : i32
    return %c0_i32 : i32
  }
  func.func @transform_1(%arg0: i32) -> (i32, i32, i32) {
    %c0_i32 = arith.constant 0 : i32
    %c0_i32_0 = arith.constant 0 : i32
    %c0_i32_1 = arith.constant 0 : i32
    return %c0_i32, %arg0, %c0_i32_0 : i32, i32, i32
  }
  func.func @transform_2(%arg0: i32) -> (i32, i32) {
    %c0_i32 = arith.constant 0 : i32
    %c0_i32_0 = arith.constant 0 : i32
    return %arg0, %c0_i32 : i32, i32
  }
}

</mosaic_0001>

<bundles_post_ra>
// kernel: tpu_custom_call.1
= control target key start
LH: loop header
LB: loop body
LE: loop exit
PB: predicated region body
PF: predicated region fallthrough
CT: control target
= control target key end

     0   :  { %7 = vsyncpa [#allocation5], 0  ;;  %s196_s0 = inlined_call_operand.hbm [shape: f32[3], index: 0, kind: input, shape index: {}]   ;;  %s197_s1 = inlined_call_operand.hbm [shape: f32[2,8,128], index: 1, kind: input, shape index: {}]   ;;  %s198_s2 = inlined_call_operand.hbm [shape: f32[8,128], index: 2, kind: output, shape index: {}]  }
   0x1   :  { %8 = vsyncpa [#allocation3], 0 }
   0x2   :  { %9 = vsyncpa [#allocation4], 0  ;;  %s80_s11 = scalar_lea.hbm %s196_s0, 16 }
   0x3   :  { %p81_p0 = scmp.ne.s32.totalorder %s196_s0, %s80_s11  ;;  %p84_p1 = scmp.lt.u32.totalorder %s80_s11, %s196_s0 }
   0x5   :  { %p86_p2 = pnand %p84_p1, %p81_p0 }
   0x7   :  { %89 = shalt.err (!%p86_p2)
}
   0x8   :  { %s140_s16 = smov [#allocation2]   ;;  %s141_s19 = smov [#allocation6]  }
   0x9   :  { %17 = dma.hbm_to_smem %s196_s0, 16, %s140_s16, [#allocation5]  }
   0xa   :  { %s23_s20 = sshll.u32 %s141_s19, 4  ;;  %s90_s23 = scalar_lea.hbm %s197_s1, 256  ;;  %s24_s20 = int_to_ptr.vmem [resolvable:$true] %s23_s20 }
   0xb   :  { %p91_p3 = scmp.ne.s32.totalorder %s197_s1, %s90_s23  ;;  %p94_p4 = scmp.lt.u32.totalorder %s90_s23, %s197_s1 }
   0xd   :  { %p96_p5 = pnand %p94_p4, %p91_p3 }
   0xf   :  { %99 = shalt.err (!%p96_p5)
}
  0x10   :  { %s100_s28 = scalar_lea.vmem %s24_s20, 256  ;;  %p105_p7 = scmp.lt.s32.totalorder %s24_s20, %s24_s20 }
  0x11   :  { %p101_p6 = scmp.ne.s32.totalorder %s24_s20, %s100_s28  ;;  %p106_p8 = scmp.lt.s32.totalorder %s100_s28, %s100_s28 }
  0x13   :  { %p107_p9 = por %p106_p8, %p105_p7 }
  0x15   :  { %p108_p10 = pnand %p107_p9, %p101_p6 }
  0x17   :  { %111 = shalt.err (!%p108_p10)
}
  0x18   :  { %s142_s0 = smov 128   ;;  %s143_s29 = smov 8  }
  0x19   :  { %29 = dma.hbm_to_vmem [thread:$0]  %s197_s1, 256, %s24_s20, [#allocation3], %s142_s0, %s142_s0, %s143_s29  }
  0x1a   :  { %134 = dma.done.wait [#allocation5], 16  }
  0x1b   :  { %135 = vsyncadd [#allocation5], 4294967280 }
  0x1c   :  { %136 = dma.done.wait [#allocation3], 256  }
  0x1d   :  { %137 = vsyncadd [#allocation3], 4294967040 }
  0x1e   :  { %36 = sfence }
  0x1f   :  { %s37_s4 = sld [smem:[#allocation2]]  ;;  %s71_s5 = sld [smem:[#allocation2 + $0x1]]  ;;  %v40_v0 = vld [vmem:[#allocation6] sm:$0xff]  ;;  %v44_v1 = vld [vmem:[#allocation6 + $0x8] sm:$0xff] }
  0x20   :  { %s72_s6 = sld [smem:[#allocation2 + $0x2]]  ;;  %s144_s1 = smov [#allocation7]  }
  0x21   :  { %s61_s7 = sshll.u32 %s144_s1, 4  ;;  %s62_s7 = int_to_ptr.vmem [resolvable:$true] %s61_s7 }
  0x22   :  { %s112_s8 = scalar_lea.vmem %s62_s7, 128  ;;  %p117_p12 = scmp.lt.s32.totalorder %s62_s7, %s62_s7 }
  0x23   :  { %p113_p11 = scmp.ne.s32.totalorder %s62_s7, %s112_s8  ;;  %p118_p13 = scmp.lt.s32.totalorder %s112_s8, %s112_s8 }
  0x25   :  { %v41_v2 = vstv %s37_s4  ;;  %v45_v3 = vstv %s71_s5  ;;  %p119_p0 = por %p118_p13, %p117_p12 }
  0x26   :  { %v42_v4 = vmul.f32 %v41_v2, %v40_v0  ;;  %v46_v5 = vmul.f32 %v45_v3, %v44_v1  ;;  %v48_v6 = vstv %s72_s6 }
  0x27   :  { %p120_p1 = pnand %p119_p0, %p113_p11 }
  0x28   :  { %v47_v7 = vadd.f32 %v46_v5, %v42_v4 }
  0x2a   :  { %v49_v8 = vadd.f32 %v48_v6, %v47_v7 }
  0x2c   :  { %v50_v9 = vmul.f32 0.5, %v49_v8 }
  0x2e   :  { %78 = vtanh.f32 %v50_v9 }
  0x38   :  { %v79_v10 = vpop.eup %78 }
  0x39   :  { %v52_v11 = vadd.f32 1.0, %v79_v10 }
  0x3b   :  { %v53_v12 = vmul.f32 0.5, %v52_v11 }
  0x3d   :  { %54 = vst [vmem:[#allocation7] sm:$0xff] %v53_v12 }
  0x3e   :  { %123 = shalt.err (!%p120_p1)
}
  0x3f   :  { %s124_s11 = scalar_lea.hbm %s198_s2, 128 }
  0x40   :  { %p125_p2 = scmp.ne.s32.totalorder %s198_s2, %s124_s11  ;;  %p128_p3 = scmp.lt.u32.totalorder %s124_s11, %s198_s2 }
  0x42   :  { %p130_p4 = pnand %p128_p3, %p125_p2 }
  0x44   :  { %133 = shalt.err (!%p130_p4)
}
  0x45   :  { %64 = dma.vmem_to_hbm [thread:$0]  %s62_s7, 128, %s198_s2, [#allocation4]  }
  0x46   :  { %138 = dma.done.wait [#allocation4], 128  }
  0x47   :  { %139 = vsyncadd [#allocation4], 4294967168 }
  0x48   :  { %68 = vsyncpa [#allocation3], 1 }
  0x49   :  { %69 = vsyncpa [#allocation4], 1 }
  0x4a   :  { %70 = vsyncpa [#allocation5], 1 }

</bundles_post_ra>
